<compile_context>
chip_gen: v7x
topology: tpu7x:2x2x1
jax: 0.10.0
libtpu: 0.0.40
codegen_flags: <defaults>
</compile_context>

<pallas_src>
import functools

import jax
import jax.numpy as jnp
from jax import lax
from jax.experimental import pallas as pl
from jax.experimental.pallas import tpu as pltpu


def _round_up(x, m):
    return (x + m - 1) // m * m


def _grid_sample_kernel(g_ref, z_ref, o_ref, *, c, h_in, w_in):
    # g_ref: [1, 2, TP]       (row 0 = gx, row 1 = gy), normalized in [-1, 1]
    # z_ref: [1, C*H_in, W_in] feature slab, resident across all P tiles
    # o_ref: [1, C, TP]
    g = g_ref[0]                       # [2, TP]
    gx = g[0:1, :]                     # [1, TP]
    gy = g[1:2, :]                     # [1, TP]
    z2 = z_ref[0]                      # [C*H, W]

    tp = gx.shape[-1]

    # align_corners=True unnormalization + padding_mode='border' clamp.
    ix = jnp.clip((gx + 1.0) * 0.5 * float(w_in - 1), 0.0, float(w_in - 1))
    iy = jnp.clip((gy + 1.0) * 0.5 * float(h_in - 1), 0.0, float(h_in - 1))

    x0 = jnp.floor(ix)
    y0 = jnp.floor(iy)
    wx1 = ix - x0
    wx0 = 1.0 - wx1
    wy1 = iy - y0
    wy0 = 1.0 - wy1

    x0i = x0.astype(jnp.int32)
    y0i = y0.astype(jnp.int32)
    x1i = jnp.minimum(x0i + 1, w_in - 1)
    y1i = jnp.minimum(y0i + 1, h_in - 1)

    # Separable weight matrices: 2 nonzeros per column each.  Duplicate indices
    # at clamped borders carry exactly zero extra weight (wx1 = 0 / wy1 = 0).
    cw = lax.broadcasted_iota(jnp.int32, (w_in, tp), 0)
    mx = (jnp.where(cw == x0i, wx0, 0.0)
          + jnp.where(cw == x1i, wx1, 0.0))            # [W, TP]
    ch = lax.broadcasted_iota(jnp.int32, (h_in, tp), 0)
    my = (jnp.where(ch == y0i, wy0, 0.0)
          + jnp.where(ch == y1i, wy1, 0.0))            # [H, TP]

    # Stage 1 (MXU): contract the W axis.  [C*H, W] @ [W, TP] -> [C*H, TP]
    s = jnp.dot(z2, mx, preferred_element_type=jnp.float32)

    # Stage 2 (VPU/XLU): MY-weighted reduction over H.  [C, H, TP] -> [C, TP]
    s3 = s.reshape(c, h_in, tp)
    out = jnp.sum(s3 * my[None, :, :], axis=1)

    o_ref[0] = out.astype(o_ref.dtype)


def grid_sample(z, grid):
    """Pallas equivalent of F.grid_sample(z, grid, align_corners=True,
    mode='bilinear', padding_mode='border').

    z:    [N, C, H_in, W_in]   float32 (NCHW, same as PyTorch)
    grid: [N, H_out, W_out, 2] float32, last dim = (x, y) in [-1, 1]
    returns [N, C, H_out, W_out] float32
    """
    n, c, h_in, w_in = z.shape
    gn, h_out, w_out, two = grid.shape
    assert gn == n and two == 2
    p = h_out * w_out

    # ---- choose the P tile (lane-dense, bounded for v7x's 64 MiB VMEM) ----
    p128 = _round_up(p, 128)
    budget = 8 * 1024 * 1024                                # per-tile working set
    per_col = 4 * (c * h_in + h_in + w_in + 2 * c + 16)     # bytes per P column
    tp = max(128, (budget // per_col) // 128 * 128)
    tp = min(tp, p128)
    p_pad = _round_up(p, tp)

    # ---- pack inputs ----
    z_flat = z.reshape(n, c * h_in, w_in).astype(jnp.float32)
    g_in = jnp.stack(
        [grid[..., 0].reshape(n, p), grid[..., 1].reshape(n, p)],
        axis=1).astype(jnp.float32)                          # [N, 2, P]
    if p_pad > p:
        # Zero-padded coordinates map to the image center -> valid samples,
        # sliced off after the kernel.
        g_in = jnp.pad(g_in, ((0, 0), (0, 0), (0, p_pad - p)))

    kernel = functools.partial(_grid_sample_kernel, c=c, h_in=h_in, w_in=w_in)

    # Scoped-VMEM budget: double-buffered I/O blocks + per-tile intermediates.
    per_step_bytes = 4 * (
        2 * (2 * tp)                 # grid block (double buffered)
        + 2 * (c * h_in * w_in)      # z slab (double buffered)
        + 2 * (c * tp)               # out block (double buffered)
        + c * h_in * tp              # stage-1 intermediate
        + (h_in + w_in + 16) * tp    # mx / my / coordinate temporaries
    )
    vmem_limit = int(min(64 * 1024 * 1024,
                         max(4 * per_step_bytes, 8 * 1024 * 1024)))

    cost = pl.CostEstimate(
        flops=2 * n * c * h_in * w_in * p_pad + 2 * n * c * h_in * p_pad,
        transcendentals=0,
        bytes_accessed=(z_flat.size + g_in.size + n * c * p_pad) * 4,
    )

    out = pl.pallas_call(
        kernel,
        out_shape=jax.ShapeDtypeStruct((n, c, p_pad), jnp.float32),
        grid_spec=pltpu.PrefetchScalarGridSpec(
            num_scalar_prefetch=0,
            grid=(n, p_pad // tp),
            in_specs=[
                # fused (gx, gy) coordinates, streamed along the P axis
                pl.BlockSpec((1, 2, tp), lambda i, j: (i, 0, j)),
                # feature slab: constant along the P axis -> stays VMEM-resident
                pl.BlockSpec((1, c * h_in, w_in), lambda i, j: (i, 0, 0)),
            ],
            out_specs=pl.BlockSpec((1, c, tp), lambda i, j: (i, 0, j)),
        ),
        compiler_params=pltpu.CompilerParams(
            dimension_semantics=("parallel", "parallel"),
            vmem_limit_bytes=vmem_limit),
        cost_estimate=cost,
    )(g_in, z_flat)

    out = out[:, :, :p].reshape(n, c, h_out, w_out)
    return out.astype(z.dtype)


def grid_sample_ref(z, grid):
    """Pure-JAX reference with identical semantics (for verification)."""
    n, c, h, w = z.shape
    gx = grid[..., 0]
    gy = grid[..., 1]
    ix = jnp.clip((gx + 1.0) * 0.5 * (w - 1), 0.0, float(w - 1))
    iy = jnp.clip((gy + 1.0) * 0.5 * (h - 1), 0.0, float(h - 1))
    x0 = jnp.floor(ix)
    y0 = jnp.floor(iy)
    wx1 = ix - x0
    wx0 = 1.0 - wx1
    wy1 = iy - y0
    wy0 = 1.0 - wy1
    x0i = x0.astype(jnp.int32)
    y0i = y0.astype(jnp.int32)
    x1i = jnp.minimum(x0i + 1, w - 1)
    y1i = jnp.minimum(y0i + 1, h - 1)

    def one(zn, y0n, x0n, y1n, x1n, a, b, cc, d):
        g = lambda yi, xi: zn[:, yi, xi]  # [C, Ho, Wo]
        return (a[None] * g(y0n, x0n) + b[None] * g(y0n, x1n)
                + cc[None] * g(y1n, x0n) + d[None] * g(y1n, x1n))

    return jax.vmap(one)(z, y0i, x0i, y1i, x1i,
                         wy0 * wx0, wy0 * wx1, wy1 * wx0, wy1 * wx1)


if __name__ == "__main__":
    key = jax.random.PRNGKey(0)
    kz, kg = jax.random.split(key)

    N, C, H, W = 2, 4, 16, 16
    Ho, Wo = 16, 16

    z = jax.random.normal(kz, (N, C, H, W), dtype=jnp.float32)
    # Include values outside [-1, 1] to exercise the border padding path.
    grid = jax.random.uniform(kg, (N, Ho, Wo, 2), dtype=jnp.float32,
                              minval=-1.2, maxval=1.2)

    out = jax.block_until_ready(grid_sample(z, grid))

    ref = grid_sample_ref(z, grid)
    assert out.shape == (N, C, Ho, Wo)
    err = jnp.max(jnp.abs(out - ref))
    assert jnp.allclose(out, ref, atol=1e-5, rtol=1e-5), f"max abs err = {err}"

    print("KERNEL_OK")
</pallas_src>

<mosaic_0001>
module attributes {stable_mosaic.version = 11 : i64} {
  func.func @_grid_sample_kernel(%arg0: i32, %arg1: i32, %arg2: memref<1x2x256xf32, #tpu.memory_space<vmem>>, %arg3: memref<1x64x16xf32, #tpu.memory_space<vmem>>, %arg4: memref<1x4x256xf32, #tpu.memory_space<vmem>>) attributes {dimension_semantics = [#tpu.dimension_semantics<parallel>, #tpu.dimension_semantics<parallel>], iteration_bounds = array<i64: 2, 1>, scalar_prefetch = 0 : i64, scratch_operands = 0 : i64, tpu.core_type = #tpu.core_type<tc>, window_params = [{transform_indices = @transform_0, window_bounds = array<i64: 1, 2, 256>}, {transform_indices = @transform_1, window_bounds = array<i64: 1, 64, 16>}, {transform_indices = @transform_2, window_bounds = array<i64: 1, 4, 256>}]} {
    %c0 = arith.constant 0 : index
    %c0_0 = arith.constant 0 : index
    %c0_1 = arith.constant 0 : index
    %0 = vector.load %arg2[%c0, %c0_0, %c0_1] : memref<1x2x256xf32, #tpu.memory_space<vmem>>, vector<1x2x256xf32>
    %1 = vector.shape_cast %0 : vector<1x2x256xf32> to vector<2x256xf32>
    %2 = vector.extract_strided_slice %1 {offsets = [0, 0], sizes = [1, 256], strides = [1, 1]} : vector<2x256xf32> to vector<1x256xf32>
    %3 = vector.extract_strided_slice %1 {offsets = [1, 0], sizes = [1, 256], strides = [1, 1]} : vector<2x256xf32> to vector<1x256xf32>
    %c0_2 = arith.constant 0 : index
    %c0_3 = arith.constant 0 : index
    %c0_4 = arith.constant 0 : index
    %4 = vector.load %arg3[%c0_2, %c0_3, %c0_4] : memref<1x64x16xf32, #tpu.memory_space<vmem>>, vector<1x64x16xf32>
    %5 = vector.shape_cast %4 : vector<1x64x16xf32> to vector<64x16xf32>
    %cst = arith.constant 1.000000e+00 : f32
    %6 = vector.broadcast %cst : f32 to vector<1x256xf32>
    %7 = arith.addf %2, %6 : vector<1x256xf32>
    %cst_5 = arith.constant 5.000000e-01 : f32
    %8 = vector.broadcast %cst_5 : f32 to vector<1x256xf32>
    %9 = arith.mulf %7, %8 : vector<1x256xf32>
    %cst_6 = arith.constant 1.500000e+01 : f32
    %10 = vector.broadcast %cst_6 : f32 to vector<1x256xf32>
    %11 = arith.mulf %9, %10 : vector<1x256xf32>
    %cst_7 = arith.constant 0.000000e+00 : f32
    %cst_8 = arith.constant 1.500000e+01 : f32
    %12 = vector.broadcast %cst_7 : f32 to vector<1x256xf32>
    %13 = arith.maximumf %12, %11 : vector<1x256xf32>
    %14 = vector.broadcast %cst_8 : f32 to vector<1x256xf32>
    %15 = arith.minimumf %14, %13 : vector<1x256xf32>
    %cst_9 = arith.constant 1.000000e+00 : f32
    %16 = vector.broadcast %cst_9 : f32 to vector<1x256xf32>
    %17 = arith.addf %3, %16 : vector<1x256xf32>
    %cst_10 = arith.constant 5.000000e-01 : f32
    %18 = vector.broadcast %cst_10 : f32 to vector<1x256xf32>
    %19 = arith.mulf %17, %18 : vector<1x256xf32>
    %cst_11 = arith.constant 1.500000e+01 : f32
    %20 = vector.broadcast %cst_11 : f32 to vector<1x256xf32>
    %21 = arith.mulf %19, %20 : vector<1x256xf32>
    %cst_12 = arith.constant 0.000000e+00 : f32
    %cst_13 = arith.constant 1.500000e+01 : f32
    %22 = vector.broadcast %cst_12 : f32 to vector<1x256xf32>
    %23 = arith.maximumf %22, %21 : vector<1x256xf32>
    %24 = vector.broadcast %cst_13 : f32 to vector<1x256xf32>
    %25 = arith.minimumf %24, %23 : vector<1x256xf32>
    %26 = math.floor %15 : vector<1x256xf32>
    %27 = math.floor %25 : vector<1x256xf32>
    %28 = arith.subf %15, %26 : vector<1x256xf32>
    %cst_14 = arith.constant 1.000000e+00 : f32
    %29 = vector.broadcast %cst_14 : f32 to vector<1x256xf32>
    %30 = arith.subf %29, %28 : vector<1x256xf32>
    %31 = arith.subf %25, %27 : vector<1x256xf32>
    %cst_15 = arith.constant 1.000000e+00 : f32
    %32 = vector.broadcast %cst_15 : f32 to vector<1x256xf32>
    %33 = arith.subf %32, %31 : vector<1x256xf32>
    %34 = arith.fptosi %26 : vector<1x256xf32> to vector<1x256xi32>
    %35 = arith.fptosi %27 : vector<1x256xf32> to vector<1x256xi32>
    %c1_i32 = arith.constant 1 : i32
    %36 = vector.broadcast %c1_i32 : i32 to vector<1x256xi32>
    %37 = arith.addi %34, %36 : vector<1x256xi32>
    %c15_i32 = arith.constant 15 : i32
    %38 = vector.broadcast %c15_i32 : i32 to vector<1x256xi32>
    %39 = arith.minsi %37, %38 : vector<1x256xi32>
    %c1_i32_16 = arith.constant 1 : i32
    %40 = vector.broadcast %c1_i32_16 : i32 to vector<1x256xi32>
    %41 = arith.addi %35, %40 : vector<1x256xi32>
    %c15_i32_17 = arith.constant 15 : i32
    %42 = vector.broadcast %c15_i32_17 : i32 to vector<1x256xi32>
    %43 = arith.minsi %41, %42 : vector<1x256xi32>
    %44 = tpu.iota {dimensions = array<i32: 0>} : vector<16x256xi32>
    %45 = vector.broadcast %34 : vector<1x256xi32> to vector<16x256xi32>
    %46 = arith.cmpi eq, %44, %45 : vector<16x256xi32>
    %cst_18 = arith.constant 0.000000e+00 : f32
    %47 = vector.shape_cast %30 : vector<1x256xf32> to vector<1x256xf32>
    %48 = vector.broadcast %47 : vector<1x256xf32> to vector<16x256xf32>
    %49 = vector.broadcast %cst_18 : f32 to vector<16x256xf32>
    %50 = arith.select %46, %48, %49 : vector<16x256xi1>, vector<16x256xf32>
    %51 = vector.broadcast %39 : vector<1x256xi32> to vector<16x256xi32>
    %52 = arith.cmpi eq, %44, %51 : vector<16x256xi32>
    %cst_19 = arith.constant 0.000000e+00 : f32
    %53 = vector.shape_cast %28 : vector<1x256xf32> to vector<1x256xf32>
    %54 = vector.broadcast %53 : vector<1x256xf32> to vector<16x256xf32>
    %55 = vector.broadcast %cst_19 : f32 to vector<16x256xf32>
    %56 = arith.select %52, %54, %55 : vector<16x256xi1>, vector<16x256xf32>
    %57 = arith.addf %50, %56 : vector<16x256xf32>
    %58 = tpu.iota {dimensions = array<i32: 0>} : vector<16x256xi32>
    %59 = vector.broadcast %35 : vector<1x256xi32> to vector<16x256xi32>
    %60 = arith.cmpi eq, %58, %59 : vector<16x256xi32>
    %cst_20 = arith.constant 0.000000e+00 : f32
    %61 = vector.shape_cast %33 : vector<1x256xf32> to vector<1x256xf32>
    %62 = vector.broadcast %61 : vector<1x256xf32> to vector<16x256xf32>
    %63 = vector.broadcast %cst_20 : f32 to vector<16x256xf32>
    %64 = arith.select %60, %62, %63 : vector<16x256xi1>, vector<16x256xf32>
    %65 = vector.broadcast %43 : vector<1x256xi32> to vector<16x256xi32>
    %66 = arith.cmpi eq, %58, %65 : vector<16x256xi32>
    %cst_21 = arith.constant 0.000000e+00 : f32
    %67 = vector.shape_cast %31 : vector<1x256xf32> to vector<1x256xf32>
    %68 = vector.broadcast %67 : vector<1x256xf32> to vector<16x256xf32>
    %69 = vector.broadcast %cst_21 : f32 to vector<16x256xf32>
    %70 = arith.select %66, %68, %69 : vector<16x256xi1>, vector<16x256xf32>
    %71 = arith.addf %64, %70 : vector<16x256xf32>
    %cst_22 = arith.constant dense<0.000000e+00> : vector<64x256xf32>
    %72 = tpu.matmul %5, %57, %cst_22 {dimension_numbers = #tpu.dot_dimension_numbers<[1], [0], [0], [1], [0, 0, 1, 1], [], []>} : vector<64x16xf32>, vector<16x256xf32>, vector<64x256xf32> -> vector<64x256xf32>
    %73 = vector.shape_cast %72 : vector<64x256xf32> to vector<4x16x256xf32>
    %74 = vector.shape_cast %71 : vector<16x256xf32> to vector<1x16x256xf32>
    %75 = vector.broadcast %74 : vector<1x16x256xf32> to vector<4x16x256xf32>
    %76 = arith.mulf %73, %75 : vector<4x16x256xf32>
    %cst_23 = arith.constant dense<0.000000e+00> : vector<4x256xf32>
    %77 = vector.multi_reduction <add>, %76, %cst_23 [1] : vector<4x16x256xf32> to vector<4x256xf32>
    %c0_24 = arith.constant 0 : index
    %c0_25 = arith.constant 0 : index
    %c0_26 = arith.constant 0 : index
    %78 = vector.load %arg4[%c0_24, %c0_25, %c0_26] : memref<1x4x256xf32, #tpu.memory_space<vmem>>, vector<1x4x256xf32>
    %79 = vector.shape_cast %78 : vector<1x4x256xf32> to vector<4x256xf32>
    %80 = vector.shape_cast %77 : vector<4x256xf32> to vector<1x4x256xf32>
    tpu.vector_store %arg4[%c0_24, %c0_25, %c0_26], %80 {strides = array<i32>} : memref<1x4x256xf32, #tpu.memory_space<vmem>>, vector<1x4x256xf32>,
    return
  }
  func.func @transform_0(%arg0: i32, %arg1: i32) -> (i32, i32, i32) {
    %c0_i32 = arith.constant 0 : i32
    %c0_i32_0 = arith.constant 0 : i32
    return %arg0, %c0_i32, %arg1 : i32, i32, i32
  }
  func.func @transform_1(%arg0: i32, %arg1: i32) -> (i32, i32, i32) {
    %c0_i32 = arith.constant 0 : i32
    %c0_i32_0 = arith.constant 0 : i32
    %c0_i32_1 = arith.constant 0 : i32
    return %arg0, %c0_i32, %c0_i32_0 : i32, i32, i32
  }
  func.func @transform_2(%arg0: i32, %arg1: i32) -> (i32, i32, i32) {
    %c0_i32 = arith.constant 0 : i32
    %c0_i32_0 = arith.constant 0 : i32
    return %arg0, %c0_i32, %arg1 : i32, i32, i32
  }
}

</mosaic_0001>

<bundles_post_ra>
// kernel: tpu_custom_call.1
= control target key start
LH: loop header
LB: loop body
LE: loop exit
PB: predicated region body
PF: predicated region fallthrough
CT: control target
= control target key end

     0   :  { %7 = vsyncpa [#allocation3], 0  ;;  %s1112_s0 = inlined_call_operand.vmem [shape: f32[2,2,256], index: 0, kind: input, shape index: {}]   ;;  %s1113_s1 = inlined_call_operand.vmem [shape: f32[2,64,16], index: 1, kind: input, shape index: {}]   ;;  %s1114_s2 = inlined_call_operand.hbm [shape: f32[2,4,256], index: 2, kind: output, shape index: {}]  }
   0x1   :  { %9 = vsyncpa [#allocation3 + $0x1], 0  ;;  %s926_s9 = smov 0   ;;  %s928_s10 = smov 0  }
   0x2   :  { %s930_s11 = smov 0   ;;  %s932_s12 = smov 0  }
   0x3   :  { %s934_s13 = smov 0   ;;  %s936_s14 = smov 0  }
   0x4 LB: > { %s739_s15 = sadd.s32 4294967295, %s907_s14   ;;  %s740_s16 = sadd.s32 4294967294, %s907_s14   ;;  %s907_s14 = sphi %s936_s14, %s15_s14   ;;  %s903_s13 = sphi %s934_s13, %s1121_s13   ;;  %s899_s12 = sphi %s932_s12, %s1120_s12   ;;  %s895_s11 = sphi %s930_s11, %s1119_s11   ;;  %s891_s10 = sphi %s928_s10, %s1118_s10   ;;  %s887_s9 = sphi %s926_s9, %s1117_s9  }
   0x5   : > { %s27_s17 = sadd.s32 1, %s903_s13  ;;  %s90_s18 = sadd.s32 1, %s895_s11 }
   0x6   : > { %p29_p0 = scmp.ge.s32.totalorder %s27_s17, 2  ;;  %p100_p1 = scmp.ne.s32.totalorder %s895_s11, %s891_s10 }
   0x7   : > { %p101_p2 = scmp.eq.s32.totalorder %s739_s15, 1  ;;  %p106_p3 = scmp.ne.s32.totalorder %s891_s10, %s887_s9 }
   0x8   : > { %s1123_s17 = smov (%p29_p0, %s27_s17), 0  ;;  %p107_p5 = scmp.eq.s32.totalorder %s740_s16, 1 }
   0x9   : > { %p966_p4 = por %p101_p2, %p100_p1  ;;  %s85_s20 = ssub.s32 %s903_s13, %s1123_s17 }
   0xa   : > { %p743_p6 = scmp.ge.s32.totalorder %s907_s14, 1  ;;  %p88_p7 = scmp.eq.s32.totalorder %s85_s20, 0 }
   0xb   : > { %p973_p8 = por %p107_p5, %p106_p3  ;;  %p146_p9 = scmp.lt.s32.totalorder %s907_s14, 3 }
   0xc   : > { %s979_s22 = scalar_select %p88_p7, %s895_s11, %s90_s18  }
   0xd   : > { %p147_p10 = pnand %p743_p6, %p146_p9 }
   0xe   : > { %p178_p11 = scmp.lt.s32.totalorder (!%p147_p10), %s899_s12, 1  ;;  %v909_v0 = vmov (!%p147_p10), 0.0   ;;  %v214_v5 = vlaneseq (!%p147_p10)  ;;  %vm395_vm9 = vcmask (!%p147_p10), 130048   ;;  %s174_s4 = sand.u32 (!%p147_p10), 1, %s891_s10  }
   0xf   : > { %150 = sbr.rel (%p147_p10) target bundleno = 326 (0x146), region = 28  ;;  %484 = vmatprep.mubr.f32.mxu0 (!%p147_p10), %v909_v0  ;;  %508 = vmatprep.mubr.f32.mxu1 (!%p147_p10), %v909_v0  ;;  %s744_s5 = sshll.u32 (!%p147_p10), %s174_s4, 3 }
  0x10   : > { %v991_v8 = vshrl.u32 (!%p147_p10), %v214_v5, 7  ;;  %s764_s6 = sshll.u32 (!%p147_p10), %s899_s12, 7  ;;  %s176_s7 = scalar_lea.vmem (!%p147_p10), [#allocation2], %s744_s5 }
  0x11   : > { %s651_s8 = sshll.u32 (!%p147_p10), %s176_s7, 4  ;;  %s1065_s18 = scalar_lea.hbm (!%p147_p10), %s1114_s2, %s764_s6  ;;  %s1067_s8 = int_to_ptr.vmem [resolvable:$true] %s651_s8 }
  0x12   : > { %v223_v12 = vsub.s32 (!%p147_p10), 2, %v991_v8  ;;  %v219_v13 = vsub.s32 (!%p147_p10), 0, %v991_v8  ;;  %v1004_v17 = vadd.s32 (!%p147_p10), 8, %v991_v8  ;;  %v309_v57 = vsub.s32 (!%p147_p10), 1, %v991_v8  ;;  %s829_s20 = scalar_lea.vmem (!%p147_p10), %s1067_s8, 128 }
  0x13   : > { %v313_v58 = vsub.s32 (!%p147_p10), 3, %v991_v8  ;;  %p830_p12 = scmp.ne.s32.totalorder (!%p147_p10), %s1067_s8, %s829_s20 }
  0x15   : > { %p831_p13 = pnand (!%p147_p10), %p830_p12, %p966_p4 }
  0x16   : > { %s985_s23 = scalar_select %p178_p11, %s899_s12, 1 }
  0x17   : > { %s635_s12 = scalar_lea.sflag [#allocation3], %s174_s4  ;;  %p832_p0 = pneg %p831_p13 }
  0x18   : > { %s762_s24 = sshll.u32 %s985_s23, 2  ;;  %s763_s28 = sshll.u32 %s985_s23, 6 }
  0x19   : > { %s185_s27 = scalar_lea.vmem %s1112_s0, %s762_s24  ;;  %s191_s3 = scalar_lea.vmem %s1113_s1, %s763_s28 }
  0x1a   : > { %v193_v1 = vld [vmem:[%s185_s27] sm:$0xf]  ;;  %v195_v51 = vld [vmem:[%s191_s3 + $0x8] sm:$0xff]  ;;  %v196_v53 = vld [vmem:[%s191_s3 + $0x10] sm:$0xff]  ;;  %s910_s23 = smov [#allocation2]  }
  0x1b   : > { %v202_v2 = vadd.f32 1.0, %v193_v1  ;;  %v194_v49 = vld [vmem:[%s191_s3] sm:$0xff]  ;;  %v199_v52 = vld [vmem:[%s191_s3 + $0x28] sm:$0xff]  ;;  %v200_v54 = vld [vmem:[%s191_s3 + $0x30] sm:$0xff]  ;;  %s833_s24 = sshll.u32 %s910_s23, 4  ;;  %s834_s24 = int_to_ptr.vmem [resolvable:$false] %s833_s24 }
  0x1c   : > { %v198_v50 = vld [vmem:[%s191_s3 + $0x20] sm:$0xff]  ;;  %v197_v55 = vld [vmem:[%s191_s3 + $0x18] sm:$0xff]  ;;  %s835_s25 = scalar_lea.vmem %s834_s24, 256  ;;  %p836_p1 = scmp.lt.s32.totalorder %s1067_s8, %s834_s24 }
  0x1d   : > { %v203_v3 = vmul.f32 0.5, %v202_v2  ;;  %v201_v56 = vld [vmem:[%s191_s3 + $0x38] sm:$0xff]  ;;  %p837_p2 = scmp.lt.s32.totalorder %s835_s25, %s829_s20 }
  0x1f   : > { %v204_v4 = vmul.f32 15.0, %v203_v3  ;;  %p838_p3 = por %p837_p2, %p836_p1 }
  0x21   : > { %v205_v6 = vmax.f32 %v204_v4, 0.0  ;;  %p839_p5 = pnand %p838_p3, %p832_p0 }
  0x23   : > { %v206_v7 = vmin.f32 %v205_v6, 15.0 }
  0x25   : > { %v207_v9 = vfloor.f32 %v206_v7 }
  0x27   : > { %v993_v10 = vsub.f32 %v206_v7, %v207_v9  ;;  %v771_v11 = vtrunc.f32 %v207_v9 }
  0x29   : > { %v998_v14 = vsub.f32 1.0, %v993_v10  ;;  %v1000_v15 = vcvt.f32.s32 %v771_v11  ;;  %v288_v20 = vrot.slane %v993_v10, %v223_v12  ;;  %v284_v23 = vrot.slane %v993_v10, %v219_v13 }
  0x2a   : > { %v372_v2 = vrot.slane %v993_v10, %v309_v57  ;;  %v376_v4 = vrot.slane %v993_v10, %v313_v58 }
  0x2b   : > { %v211_v16 = vadd.s32 1, %v1000_v15  ;;  %v224_v18 = vrot.slane %v1000_v15, %v223_v12  ;;  %v245_v19 = vrot.slane %v998_v14, %v223_v12  ;;  %v220_v21 = vrot.slane %v1000_v15, %v219_v13 }
  0x2c   : > { %v241_v22 = vrot.slane %v998_v14, %v219_v13  ;;  %v298_v31 = vrot.slane %v288_v20, %v219_v13  ;;  %v294_v32 = vrot.slane %v284_v23, %v219_v13  ;;  %v310_v59 = vrot.slane %v1000_v15, %v309_v57 }
  0x2d   : > { %vm212_vm0 = vcmp.lt.s32.totalorder %v211_v16, 15  ;;  %v232_v24 = vrot.slane %v224_v18, %v219_v13  ;;  %v255_v26 = vrot.slane %v245_v19, %v219_v13  ;;  %v228_v27 = vrot.slane %v220_v21, %v219_v13 }
  0x2e   : > { %v1012_v25 = vsel %vm212_vm0, %v211_v16, 15  ;;  %v251_v28 = vrot.slane %v241_v22, %v219_v13  ;;  %v314_v61 = vrot.slane %v1000_v15, %v313_v58  ;;  %v318_v63 = vrot.slane %v310_v59, %v309_v57 }
  0x2f   : > { %vm234_vm1 = vcmp.eq.s32.totalorder %v991_v8, %v232_v24  ;;  %vm236_vm2 = vcmp.eq.s32.totalorder %v1004_v17, %v232_v24  ;;  %v267_v29 = vrot.slane %v1012_v25, %v223_v12  ;;  %v263_v30 = vrot.slane %v1012_v25, %v219_v13 }
  0x30   : > { %vm233_vm3 = vcmp.eq.s32.totalorder %v991_v8, %v228_v27  ;;  %vm235_vm4 = vcmp.eq.s32.totalorder %v1004_v17, %v228_v27  ;;  %v257_v35 = vsel %vm234_vm1, %v255_v26, 0.0  ;;  %v259_v36 = vsel %vm236_vm2, %v255_v26, 0.0 }
  0x31   : > { %v275_v33 = vrot.slane %v267_v29, %v219_v13  ;;  %v271_v34 = vrot.slane %v263_v30, %v219_v13  ;;  %v256_v37 = vsel %vm233_vm3, %v251_v28, 0.0  ;;  %v258_v38 = vsel %vm235_vm4, %v251_v28, 0.0 }
  0x32   : > { %v352_v60 = vrot.slane %v1012_v25, %v309_v57  ;;  %v356_v62 = vrot.slane %v1012_v25, %v313_v58  ;;  %v334_v3 = vrot.slane %v998_v14, %v313_v58  ;;  %v322_v5 = vrot.slane %v314_v61, %v309_v57 }
  0x33   : > { %vm277_vm5 = vcmp.eq.s32.totalorder %v991_v8, %v275_v33  ;;  %vm279_vm6 = vcmp.eq.s32.totalorder %v1004_v17, %v275_v33  ;;  %vm276_vm7 = vcmp.eq.s32.totalorder %v991_v8, %v271_v34  ;;  %vm278_vm8 = vcmp.eq.s32.totalorder %v1004_v17, %v271_v34 }
  0x34   : > { %v300_v39 = vsel %vm277_vm5, %v298_v31, 0.0  ;;  %v302_v40 = vsel %vm279_vm6, %v298_v31, 0.0  ;;  %v299_v41 = vsel %vm276_vm7, %v294_v32, 0.0  ;;  %v301_v42 = vsel %vm278_vm8, %v294_v32, 0.0 }
  0x35   : > { %v304_v43 = vadd.f32 %v300_v39, %v257_v35  ;;  %v306_v44 = vadd.f32 %v302_v40, %v259_v36  ;;  %v303_v45 = vadd.f32 %v299_v41, %v256_v37  ;;  %v305_v46 = vadd.f32 %v301_v42, %v258_v38 }
  0x36   : > { %v360_v1 = vrot.slane %v352_v60, %v309_v57  ;;  %v364_v6 = vrot.slane %v356_v62, %v309_v57  ;;  %vm323_vm10 = vcmp.eq.s32.totalorder %v991_v8, %v318_v63  ;;  %v382_v9 = vrot.slane %v372_v2, %v309_v57 }
  0x37   : > { %v765_v47 = vpack.c.bf16 %v306_v44, %v304_v43  ;;  %v767_v48 = vpack.c.bf16 %v305_v46, %v303_v45  ;;  %v344_v11 = vrot.slane %v334_v3, %v309_v57  ;;  %v386_v12 = vrot.slane %v376_v4, %v309_v57 }
  0x38   : > { %vm365_vm11 = vcmp.eq.s32.totalorder %v991_v8, %v360_v1  ;;  %vm325_vm12 = vcmp.eq.s32.totalorder %v1004_v17, %v318_v63  ;;  %vm367_vm13 = vcmp.eq.s32.totalorder %v1004_v17, %v360_v1  ;;  %vm324_vm14 = vcmp.eq.s32.totalorder %v991_v8, %v322_v5 }
  0x39   : > { %766 = vmatprep.subr.bf16.mxu0 %v765_v47  ;;  %769 = vmatprep.subr.bf16.mxu1 %v765_v47  ;;  %vm366_vm15 = vcmp.eq.s32.totalorder %v991_v8, %v364_v6  ;;  %vm326_vm0 = vcmp.eq.s32.totalorder %v1004_v17, %v322_v5  ;;  %vm368_vm1 = vcmp.eq.s32.totalorder %v1004_v17, %v364_v6  ;;  %v387_v13 = vsel %vm365_vm11, %v382_v9, 0.0 }
  0x3a   : > { %768 = vmatpush1.bf16.msra.mxu0 %v767_v48  ;;  %770 = vmatpush1.bf16.msra.mxu1 %v767_v48  ;;  %v389_v15 = vsel %vm367_vm13, %v382_v9, 0.0  ;;  %v346_v16 = vsel %vm324_vm14, %v344_v11, 0.0  ;;  %v388_v18 = vsel %vm366_vm15, %v386_v12, 0.0  ;;  %v348_v19 = vsel %vm326_vm0, %v344_v11, 0.0 }
  0x3b   : > { %v390_v20 = vsel %vm368_vm1, %v386_v12, 0.0  ;;  %v392_v27 = vadd.f32 %v388_v18, %v346_v16  ;;  %vm618_vm2 = vcmask 1041409   ;;  %vm620_vm3 = vcmask 1045509  }
  0x3c   : > { %v394_v8 = vadd.f32 %v390_v20, %v348_v19  ;;  %vm623_vm4 = vcmask 1042434   ;;  %vm625_vm5 = vcmask 1046534   ;;  %vm628_vm6 = vcmask 1043459  }
  0x3d   : > { %749 = vmatmul.mubr.msk.f32.vlgmr.msra.gmra.mrb[0].mxu0 %vm395_vm9, %v194_v49  ;;  %753 = vmatmul.mubr.msk.f32.vlgmr.msra.gmra.mrb[0].mxu1 %vm395_vm9, %v198_v50  ;;  %vm630_vm7 = vcmask 1047559  }
  0x3e   : > { %490 = vmatprep.mubr.f32.mxu0 %v909_v0  ;;  %514 = vmatprep.mubr.f32.mxu1 %v909_v0 }
  0x41   : > { %750 = vmatmul.mubr.msk.f32.gmra.mrb[2].mxu0 %vm395_vm9, %v195_v51  ;;  %754 = vmatmul.mubr.msk.f32.gmra.mrb[2].mxu1 %vm395_vm9, %v199_v52 }
  0x42   : > { %496 = vmatprep.mubr.f32.mxu0 %v909_v0  ;;  %520 = vmatprep.mubr.f32.mxu1 %v909_v0 }
  0x45   : > { %751 = vmatmul.mubr.msk.f32.gmra.mrb[4].mxu0 %vm395_vm9, %v196_v53  ;;  %755 = vmatmul.mubr.msk.f32.gmra.mrb[4].mxu1 %vm395_vm9, %v200_v54 }
  0x46   : > { %502 = vmatprep.mubr.f32.mxu0 %v909_v0  ;;  %526 = vmatprep.mubr.f32.mxu1 %v909_v0  ;;  %v330_v0 = vrot.slane %v998_v14, %v309_v57 }
  0x48   : > { %v340_v7 = vrot.slane %v330_v0, %v309_v57 }
  0x49   : > { %752 = vmatmul.mubr.msk.f32.gmra.mrb[6].mxu0 %vm395_vm9, %v197_v55  ;;  %756 = vmatmul.mubr.msk.f32.gmra.mrb[6].mxu1 %vm395_vm9, %v201_v56 }
  0x4a   : > { %v345_v10 = vsel %vm323_vm10, %v340_v7, 0.0  ;;  %v347_v14 = vsel %vm325_vm12, %v340_v7, 0.0 }
  0x4b   : > { %v391_v23 = vadd.f32 %v387_v13, %v345_v10  ;;  %v393_v26 = vadd.f32 %v389_v15, %v347_v14 }
 0x110   : > { %v486_v21 = vpop.f32.mrb[0].mxu0  ;;  %v510_v22 = vpop.f32.mrb[0].mxu1 }
 0x111   : > { %v488_v24 = vpop.f32.mrb[1].mxu0  ;;  %v512_v25 = vpop.f32.mrb[1].mxu1  ;;  %v541_v28 = vmul.f32 %v510_v22, %v391_v23  ;;  %v533_v31 = vmul.f32 %v486_v21, %v391_v23 }
 0x112   : > { %v542_v29 = vmul.f32 %v512_v25, %v392_v27  ;;  %v534_v36 = vmul.f32 %v488_v24, %v392_v27 }
 0x114   : > { %v492_v30 = vpop.f32.mrb[2].mxu0  ;;  %v516_v17 = vpop.f32.mrb[2].mxu1 }
 0x115   : > { %v535_v32 = vmul.f32 %v492_v30, %v393_v26  ;;  %v543_v33 = vmul.f32 %v516_v17, %v393_v26  ;;  %v494_v34 = vpop.f32.mrb[3].mxu0  ;;  %v518_v35 = vpop.f32.mrb[3].mxu1 }
 0x116   : > { %v536_v37 = vmul.f32 %v494_v34, %v394_v8  ;;  %v544_v38 = vmul.f32 %v518_v35, %v394_v8 }
 0x117   : > { %v549_v39 = vadd.f32 %v535_v32, %v533_v31  ;;  %v577_v40 = vadd.f32 %v543_v33, %v541_v28 }
 0x118   : > { %v556_v41 = vadd.f32 %v536_v37, %v534_v36  ;;  %v584_v42 = vadd.f32 %v544_v38, %v542_v29  ;;  %v498_v43 = vpop.f32.mrb[4].mxu0  ;;  %v522_v44 = vpop.f32.mrb[4].mxu1 }
 0x119   : > { %v550_v45 = vrot.slane %v549_v39, 4  ;;  %v578_v46 = vrot.slane %v577_v40, 4  ;;  %v500_v47 = vpop.f32.mrb[5].mxu0  ;;  %v524_v48 = vpop.f32.mrb[5].mxu1  ;;  %v537_v53 = vmul.f32 %v498_v43, %v391_v23  ;;  %v545_v54 = vmul.f32 %v522_v44, %v391_v23 }
 0x11a   : > { %v557_v49 = vrot.slane %v556_v41, 4  ;;  %v585_v50 = vrot.slane %v584_v42, 4  ;;  %v538_v57 = vmul.f32 %v500_v47, %v392_v27  ;;  %v546_v58 = vmul.f32 %v524_v48, %v392_v27 }
 0x11b   : > { %v551_v51 = vadd.f32 %v550_v45, %v549_v39  ;;  %v579_v52 = vadd.f32 %v578_v46, %v577_v40 }
 0x11c   : > { %v558_v55 = vadd.f32 %v557_v49, %v556_v41  ;;  %v586_v56 = vadd.f32 %v585_v50, %v584_v42  ;;  %v504_v59 = vpop.f32.mrb[6].mxu0  ;;  %v528_v60 = vpop.f32.mrb[6].mxu1 }
 0x11d   : > { %v552_v61 = vrot.slane %v551_v51, 2  ;;  %v580_v62 = vrot.slane %v579_v52, 2  ;;  %v539_v63 = vmul.f32 %v504_v59, %v393_v26  ;;  %v547_v0 = vmul.f32 %v528_v60, %v393_v26  ;;  %v506_v1 = vpop.f32.mrb[7].mxu0  ;;  %v530_v2 = vpop.f32.mrb[7].mxu1 }
 0x11e   : > { %v559_v3 = vrot.slane %v558_v55, 2  ;;  %v587_v4 = vrot.slane %v586_v56, 2  ;;  %v540_v5 = vmul.f32 %v506_v1, %v394_v8  ;;  %v548_v6 = vmul.f32 %v530_v2, %v394_v8 }
 0x11f   : > { %v553_v7 = vadd.f32 %v552_v61, %v551_v51  ;;  %v581_v9 = vadd.f32 %v580_v62, %v579_v52  ;;  %v563_v11 = vadd.f32 %v539_v63, %v537_v53  ;;  %v591_v12 = vadd.f32 %v547_v0, %v545_v54 }
 0x120   : > { %v560_v10 = vadd.f32 %v559_v3, %v558_v55  ;;  %v588_v13 = vadd.f32 %v587_v4, %v586_v56  ;;  %v570_v14 = vadd.f32 %v540_v5, %v538_v57  ;;  %v598_v15 = vadd.f32 %v548_v6, %v546_v58 }
 0x121   : > { %v554_v16 = vrot.slane %v553_v7, 1  ;;  %v582_v18 = vrot.slane %v581_v9, 1  ;;  %v564_v19 = vrot.slane %v563_v11, 4  ;;  %v592_v20 = vrot.slane %v591_v12, 4 }
 0x122   : > { %v561_v21 = vrot.slane %v560_v10, 1  ;;  %v589_v22 = vrot.slane %v588_v13, 1  ;;  %v571_v23 = vrot.slane %v570_v14, 4  ;;  %v599_v24 = vrot.slane %v598_v15, 4 }
 0x123   : > { %v555_v25 = vadd.f32 %v554_v16, %v553_v7  ;;  %v583_v26 = vadd.f32 %v582_v18, %v581_v9  ;;  %v565_v27 = vadd.f32 %v564_v19, %v563_v11  ;;  %v593_v8 = vadd.f32 %v592_v20, %v591_v12 }
 0x124   : > { %v562_v28 = vadd.f32 %v561_v21, %v560_v10  ;;  %v590_v29 = vadd.f32 %v589_v22, %v588_v13  ;;  %v572_v30 = vadd.f32 %v571_v23, %v570_v14  ;;  %v600_v17 = vadd.f32 %v599_v24, %v598_v15 }
 0x125   : > { %v566_v31 = vrot.slane %v565_v27, 2  ;;  %v594_v32 = vrot.slane %v593_v8, 2 }
 0x126   : > { %v613_v33 = vcombine.low %v555_v25, %v562_v28  ;;  %v615_v34 = vcombine.low %v583_v26, %v590_v29  ;;  %v573_v35 = vrot.slane %v572_v30, 2  ;;  %v601_v36 = vrot.slane %v600_v17, 2 }
 0x127   : > { %v567_v37 = vadd.f32 %v566_v31, %v565_v27  ;;  %v595_v38 = vadd.f32 %v594_v32, %v593_v8 }
 0x128   : > { %v574_v39 = vadd.f32 %v573_v35, %v572_v30  ;;  %v602_v40 = vadd.f32 %v601_v36, %v600_v17  ;;  %v622_v52 = vrot.slane %v615_v34, 6 }
 0x129   : > { %v568_v41 = vrot.slane %v567_v37, 1  ;;  %v596_v42 = vrot.slane %v595_v38, 1 }
 0x12a   : > { %v575_v43 = vrot.slane %v574_v39, 1  ;;  %v603_v44 = vrot.slane %v602_v40, 1 }
 0x12b   : > { %v569_v45 = vadd.f32 %v568_v41, %v567_v37  ;;  %v597_v46 = vadd.f32 %v596_v42, %v595_v38 }
 0x12c   : > { %v576_v47 = vadd.f32 %v575_v43, %v574_v39  ;;  %v604_v48 = vadd.f32 %v603_v44, %v602_v40 }
 0x12e   : > { %v614_v49 = vcombine.low %v569_v45, %v576_v47  ;;  %v616_v50 = vcombine.low %v597_v46, %v604_v48 }
 0x130   : > { %v617_v51 = vrot.slane %v614_v49, 7  ;;  %v627_v56 = vrot.slane %v616_v50, 5 }
 0x132   : > { %v619_v53 = vsel %vm618_vm2, %v617_v51, %v613_v33 }
 0x133   : > { %v621_v54 = vsel %vm620_vm3, %v617_v51, %v619_v53 }
 0x134   : > { %v624_v55 = vsel %vm623_vm4, %v622_v52, %v621_v54 }
 0x135   : > { %v626_v57 = vsel %vm625_vm5, %v622_v52, %v624_v55 }
 0x136   : > { %v629_v58 = vsel %vm628_vm6, %v627_v56, %v626_v57 }
 0x137   : > { %v631_v59 = vsel %vm630_vm7, %v627_v56, %v629_v58 }
 0x138   : > { %633 = vst [vmem:[%s176_s7] sm:$0xff] %v631_v59 }
 0x139   : > { %842 = shalt.err (!%p839_p5)
}
 0x13a   : > { %s843_s26 = scalar_lea.hbm %s1065_s18, 128  ;;  %s847_s29 = scalar_lea.hbm %s1114_s2, 256 }
 0x13b   : > { %p844_p6 = scmp.ne.s32.totalorder %s1065_s18, %s843_s26  ;;  %p848_p10 = scmp.lt.u32.totalorder %s1065_s18, %s1114_s2 }
 0x13c   : > { %p849_p11 = scmp.lt.u32.totalorder %s847_s29, %s843_s26  ;;  %p851_p13 = scmp.lt.u32.totalorder %s843_s26, %s1065_s18 }
 0x13d   : > { %p845_p7 = pnand %p844_p6, %p966_p4 }
 0x13e   : > { %p850_p12 = por %p849_p11, %p848_p10 }
 0x13f   : > { %p846_p9 = pneg %p845_p7 }
 0x140   : > { %p852_p0 = por %p851_p13, %p850_p12 }
 0x142   : > { %p853_p1 = pnand %p852_p0, %p846_p9 }
 0x144   : > { %856 = shalt.err (!%p853_p1)
}
 0x145   : > { %773 = dma.vmem_to_hbm [thread:$0]  (%p966_p4), %s1067_s8, 128, %s1065_s18, %s635_s12  }
 0x146 PF: > { %p779_p2 = scmp.ge.s32.totalorder %s907_s14, 2  ;;  %s663_s4 = sand.u32 1, %s887_s9  }
 0x147   : > { %s664_s5 = scalar_lea.sflag [#allocation3], %s663_s4 }
 0x148   : > { %p776_p3 = pnand %p779_p2, %p973_p8 }
 0x14a   : > { %882 = dma.done.wait (!%p776_p3), %s664_s5, 128  }
 0x14b   : > { %884 = vsyncadd (!%p776_p3), %s664_s5, 4294967168  ;;  %s15_s14 = sadd.s32 1, %s907_s14   ;;  %s1117_s9 = smov %s891_s10 }
 0x14c   : > { %p12_p5 = scmp.ge.s32.totalorder %s15_s14, 4   ;;  %s1118_s10 = smov %s895_s11 }
 0x14d   : > { %s1119_s11 = smov %s979_s22  ;;  %s1120_s12 = smov %s903_s13 }
 0x14e   : > { %s1121_s13 = smov %s1123_s17  ;;  %14 = sbr.rel (!%p12_p5) target bundleno = 4 (0x4), region = 66 }
 0x155   :  { %669 = vsyncpa [#allocation3], 1 }
 0x156   :  { %671 = vsyncpa [#allocation3 + $0x1], 1 }

</bundles_post_ra>
